<compile_context>
chip_gen: v5e
topology: v5e:2x2
jax: 0.10.0
libtpu: 0.0.40
codegen_flags: <defaults>
</compile_context>

<pallas_src>
import numpy as np

import jax
import jax.numpy as jnp
from jax.experimental import pallas as pl
from jax.experimental.pallas import tpu as pltpu


def _heads_epilogue(acc, smask, qmask):
    """Per-head epilogues on an f32 [rows, P] slab using f32 lane masks.
    scale column: relu(x + 1) + 1e-12; quat columns: F.normalize, i.e.
    q * rsqrt(max(||q||^2, 1e-24)) == q / max(||q||, 1e-12)."""
    scale_val = jnp.maximum(acc + 1.0, 0.0) + 1e-12
    acc = acc + smask * (scale_val - acc)          # where(smask, scale_val, acc)
    q = acc * qmask
    q_sq = jnp.sum(q * q, axis=-1, keepdims=True)  # XLU reduce
    inv = jax.lax.rsqrt(jnp.maximum(q_sq, 1e-24))  # EUP rsqrt (no sqrt+divide)
    return acc * (1.0 + qmask * (inv - 1.0))       # where(qmask, acc*inv, acc)


def _fused_heads_kernel(feat_ref, wt_ref, b_ref, smask_ref, qmask_ref, out_ref):
    # bf16 MXU operands (native on v5e/v6e/v7x), f32 accumulate; all epilogue
    # math stays f32.  P is a multiple of 128 -> lane-dense unmasked store.
    acc = jnp.dot(feat_ref[...].astype(wt_ref.dtype), wt_ref[...],
                  preferred_element_type=jnp.float32)
    acc = acc + b_ref[...]                         # [1, P] f32 bias broadcast
    out_ref[...] = _heads_epilogue(
        acc, smask_ref[...], qmask_ref[...]).astype(out_ref.dtype)


def fuse_code_predictor_params(w_shape, b_shape, w_scale, b_scale,
                               w_trans, b_trans, w_quat, b_quat,
                               mxu_dtype=jnp.bfloat16):
    """Init-time packing (NOT in the hot path): concat all heads (PyTorch
    [out, nz] convention), transpose once to [nz, P] with P padded up to a
    multiple of 128 lanes, cast weights to the MXU operand dtype (bf16), keep
    bias in f32, and precompute the [1, P] f32 scale/quat lane masks."""
    w = jnp.concatenate([w_shape, w_scale, w_trans, w_quat], axis=0)   # [T, nz]
    b = jnp.concatenate([b_shape, b_scale, b_trans, b_quat], axis=0)   # [T]
    total, nz = w.shape
    P = max(128, ((total + 127) // 128) * 128)

    wt = jnp.zeros((nz, P), mxu_dtype).at[:, :total].set(w.T.astype(mxu_dtype))
    bias = jnp.zeros((1, P), jnp.float32).at[0, :total].set(
        b.astype(jnp.float32))

    shape_end = w_shape.shape[0]
    scale_col = shape_end
    trans_start = scale_col + w_scale.shape[0]
    quat_start = trans_start + w_trans.shape[0]
    quat_len = w_quat.shape[0]

    lane = jnp.arange(P)
    scale_mask = ((lane >= scale_col) & (lane < trans_start)
                  ).astype(jnp.float32).reshape(1, P)
    quat_mask = ((lane >= quat_start) & (lane < quat_start + quat_len)
                 ).astype(jnp.float32).reshape(1, P)

    return dict(wt=wt, bias=bias, scale_mask=scale_mask, quat_mask=quat_mask,
                P=P, total=total, shape_end=shape_end, scale_col=scale_col,
                trans_start=trans_start, quat_start=quat_start,
                quat_len=quat_len)


def code_predictor_forward(feat, params, n_kp, *, out_dtype=None,
                           max_tile_b=1024, min_pallas_batch=64,
                           force_pallas=False):
    """feat: [B, nz] f32.  Returns (delta_v [B, n_kp, 3], scale [B, 1],
    trans [B, 2], quat [B, 4]) matching CodePredictor.forward semantics."""
    B, nz = feat.shape
    P = params["P"]
    out_dtype = feat.dtype if out_dtype is None else out_dtype

    wt, bias = params["wt"], params["bias"]
    smask, qmask = params["scale_mask"], params["quat_mask"]
    shape_end = params["shape_end"]
    scale_col = params["scale_col"]
    trans_start = params["trans_start"]
    quat_start = params["quat_start"]
    assert shape_end == n_kp * 3
    assert wt.shape == (nz, P)

    if B < min_pallas_batch and not force_pallas:
        # Launch-overhead-bound regime: a plain XLA fusion beats a custom call.
        acc = jnp.dot(feat.astype(wt.dtype), wt,
                      preferred_element_type=jnp.float32) + bias
        out = _heads_epilogue(acc, smask, qmask).astype(out_dtype)
    else:
        # Robust tiling: <=1024-row tiles, grid >= 2 whenever B permits so both
        # v7x TensorCores get work; batch padded to grid*tile and sliced after.
        tile_b = min(max_tile_b, max(1, pl.cdiv(B, 2)))
        tile_b = max(8, ((tile_b + 7) // 8) * 8)        # sublane-aligned
        grid_b = pl.cdiv(B, tile_b)
        b_pad = grid_b * tile_b
        feat_p = feat if b_pad == B else jnp.pad(feat, ((0, b_pad - B), (0, 0)))

        feat_spec_kwargs = {}
        if grid_b >= 3:
            # Per-step compute (K=32 matmul + short epilogue) is small vs the
            # per-step DMA; an extra input buffer is only tile_b*nz*4 bytes.
            feat_spec_kwargs["pipeline_mode"] = pl.Buffered(3)

        cost = pl.CostEstimate(
            flops=2 * b_pad * nz * P,
            transcendentals=b_pad,
            bytes_accessed=(np.dtype(feat.dtype).itemsize * b_pad * nz
                            + np.dtype(wt.dtype).itemsize * nz * P
                            + 4 * 3 * P
                            + np.dtype(out_dtype).itemsize * b_pad * P),
        )

        out_padded = pl.pallas_call(
            _fused_heads_kernel,
            out_shape=jax.ShapeDtypeStruct((b_pad, P), out_dtype),
            grid=(grid_b,),
            in_specs=[
                pl.BlockSpec((tile_b, nz), lambda i: (i, 0),
                             **feat_spec_kwargs),
                pl.BlockSpec((nz, P), lambda i: (0, 0)),
                pl.BlockSpec((1, P), lambda i: (0, 0)),
                pl.BlockSpec((1, P), lambda i: (0, 0)),
                pl.BlockSpec((1, P), lambda i: (0, 0)),
            ],
            out_specs=pl.BlockSpec((tile_b, P), lambda i: (i, 0)),
            compiler_params=pltpu.CompilerParams(
                dimension_semantics=("parallel",)),
            cost_estimate=cost,
        )(feat_p, wt, bias, smask, qmask)
        out = out_padded[:B]

    delta_v = out[:, :shape_end].reshape(B, n_kp, 3)
    scale = out[:, scale_col:scale_col + 1]
    trans = out[:, trans_start:trans_start + 2]
    quat = out[:, quat_start:quat_start + 4]
    return delta_v, scale, trans, quat


if __name__ == "__main__":
    NZ, N_KP = 32, 16
    bound = 1.0 / (NZ ** 0.5)

    key = jax.random.PRNGKey(0)
    ks = jax.random.split(key, 10)

    # Per-head params: nn.Linear default U[-1/sqrt(nz), 1/sqrt(nz)], plus
    # ShapePredictor's weight override normal(0, 1e-4).
    w_shape = 1e-4 * jax.random.normal(ks[0], (N_KP * 3, NZ), jnp.float32)
    b_shape = jax.random.uniform(ks[1], (N_KP * 3,), jnp.float32, -bound, bound)
    w_scale = jax.random.uniform(ks[2], (1, NZ), jnp.float32, -bound, bound)
    b_scale = jax.random.uniform(ks[3], (1,), jnp.float32, -bound, bound)
    w_trans = jax.random.uniform(ks[4], (2, NZ), jnp.float32, -bound, bound)
    b_trans = jax.random.uniform(ks[5], (2,), jnp.float32, -bound, bound)
    w_quat = jax.random.uniform(ks[6], (4, NZ), jnp.float32, -bound, bound)
    b_quat = jax.random.uniform(ks[7], (4,), jnp.float32, -bound, bound)

    # One-time packing (outside the hot path).
    params = fuse_code_predictor_params(w_shape, b_shape, w_scale, b_scale,
                                        w_trans, b_trans, w_quat, b_quat)

    def reference(feat):
        # Matches CodePredictor.forward, applying the same bf16 MXU-operand
        # cast the kernel uses (f32 accumulate + f32 epilogue).
        def lin(w, b):
            return jnp.dot(feat.astype(jnp.bfloat16), w.T.astype(jnp.bfloat16),
                           preferred_element_type=jnp.float32) + b
        Bn = feat.shape[0]
        shape_ref = lin(w_shape, b_shape).reshape(Bn, N_KP, 3)
        scale_ref = jnp.maximum(lin(w_scale, b_scale) + 1.0, 0.0) + 1e-12
        trans_ref = lin(w_trans, b_trans)
        q = lin(w_quat, b_quat)
        quat_ref = q / jnp.maximum(
            jnp.linalg.norm(q, axis=1, keepdims=True), 1e-12)
        return shape_ref, scale_ref, trans_ref, quat_ref

    def check(outs, refs, atol, rtol):
        for o, r in zip(outs, refs):
            o32 = o.astype(jnp.float32)
            assert o.shape == r.shape, (o.shape, r.shape)
            assert jnp.allclose(o32, r, atol=atol, rtol=rtol), \
                float(jnp.max(jnp.abs(o32 - r)))

    # Test 1: small batch, Pallas kernel forced (single padded block), plus the
    # small-batch XLA fallback path used in production at tiny B.
    feat_small = jax.random.normal(ks[8], (4, NZ), jnp.float32)
    outs = code_predictor_forward(feat_small, params, N_KP, force_pallas=True)
    jax.block_until_ready(outs)
    check(outs, reference(feat_small), atol=1e-5, rtol=1e-5)

    outs_fb = code_predictor_forward(feat_small, params, N_KP)
    jax.block_until_ready(outs_fb)
    check(outs_fb, reference(feat_small), atol=1e-5, rtol=1e-5)

    # Test 2: non-multiple batch -> padding, grid=3 (Buffered(3) feat pipeline),
    # parallel batch axis for v7x megacore.
    feat_big = jax.random.normal(ks[9], (300, NZ), jnp.float32)
    outs_big = code_predictor_forward(feat_big, params, N_KP, max_tile_b=128)
    jax.block_until_ready(outs_big)
    check(outs_big, reference(feat_big), atol=1e-5, rtol=1e-5)

    # Test 3: bf16 output option (halves the dominant writeback stream).
    outs_bf16 = code_predictor_forward(feat_big, params, N_KP, max_tile_b=128,
                                       out_dtype=jnp.bfloat16)
    jax.block_until_ready(outs_bf16)
    check(outs_bf16, reference(feat_big), atol=2e-2, rtol=2e-2)

    print("KERNEL_OK")
</pallas_src>

<mosaic_0001>
module attributes {stable_mosaic.version = 11 : i64} {
  func.func @_fused_heads_kernel(%arg0: i32, %arg1: memref<8x32xf32, #tpu.memory_space<vmem>>, %arg2: memref<32x128xbf16, #tpu.memory_space<vmem>>, %arg3: memref<1x128xf32, #tpu.memory_space<vmem>>, %arg4: memref<1x128xf32, #tpu.memory_space<vmem>>, %arg5: memref<1x128xf32, #tpu.memory_space<vmem>>, %arg6: memref<8x128xf32, #tpu.memory_space<vmem>>) attributes {dimension_semantics = [#tpu.dimension_semantics<parallel>], iteration_bounds = array<i64: 1>, scalar_prefetch = 0 : i64, scratch_operands = 0 : i64, tpu.core_type = #tpu.core_type<tc>, window_params = [{transform_indices = @transform_0, window_bounds = array<i64: 8, 32>}, {pipeline_mode = #tpu.pipeline_mode<synchronous>, transform_indices = @transform_1, window_bounds = array<i64: 32, 128>}, {pipeline_mode = #tpu.pipeline_mode<synchronous>, transform_indices = @transform_2, window_bounds = array<i64: 1, 128>}, {pipeline_mode = #tpu.pipeline_mode<synchronous>, transform_indices = @transform_3, window_bounds = array<i64: 1, 128>}, {pipeline_mode = #tpu.pipeline_mode<synchronous>, transform_indices = @transform_4, window_bounds = array<i64: 1, 128>}, {transform_indices = @transform_5, window_bounds = array<i64: 8, 128>}]} {
    %c0 = arith.constant 0 : index
    %c0_0 = arith.constant 0 : index
    %0 = vector.load %arg1[%c0, %c0_0] : memref<8x32xf32, #tpu.memory_space<vmem>>, vector<8x32xf32>
    %1 = arith.truncf %0 : vector<8x32xf32> to vector<8x32xbf16>
    %c0_1 = arith.constant 0 : index
    %c0_2 = arith.constant 0 : index
    %2 = vector.load %arg2[%c0_1, %c0_2] : memref<32x128xbf16, #tpu.memory_space<vmem>>, vector<32x128xbf16>
    %cst = arith.constant dense<0.000000e+00> : vector<8x128xf32>
    %3 = tpu.matmul %1, %2, %cst {dimension_numbers = #tpu.dot_dimension_numbers<[1], [0], [0], [1], [0, 0, 1, 1], [], []>} : vector<8x32xbf16>, vector<32x128xbf16>, vector<8x128xf32> -> vector<8x128xf32>
    %c0_3 = arith.constant 0 : index
    %c0_4 = arith.constant 0 : index
    %4 = vector.load %arg3[%c0_3, %c0_4] : memref<1x128xf32, #tpu.memory_space<vmem>>, vector<1x128xf32>
    %5 = vector.broadcast %4 : vector<1x128xf32> to vector<8x128xf32>
    %6 = arith.addf %3, %5 : vector<8x128xf32>
    %c0_5 = arith.constant 0 : index
    %c0_6 = arith.constant 0 : index
    %7 = vector.load %arg4[%c0_5, %c0_6] : memref<1x128xf32, #tpu.memory_space<vmem>>, vector<1x128xf32>
    %c0_7 = arith.constant 0 : index
    %c0_8 = arith.constant 0 : index
    %8 = vector.load %arg5[%c0_7, %c0_8] : memref<1x128xf32, #tpu.memory_space<vmem>>, vector<1x128xf32>
    %cst_9 = arith.constant 1.000000e+00 : f32
    %9 = vector.broadcast %cst_9 : f32 to vector<8x128xf32>
    %10 = arith.addf %6, %9 : vector<8x128xf32>
    %cst_10 = arith.constant 0.000000e+00 : f32
    %11 = vector.broadcast %cst_10 : f32 to vector<8x128xf32>
    %12 = arith.maximumf %10, %11 : vector<8x128xf32>
    %cst_11 = arith.constant 9.99999996E-13 : f32
    %13 = vector.broadcast %cst_11 : f32 to vector<8x128xf32>
    %14 = arith.addf %12, %13 : vector<8x128xf32>
    %15 = arith.subf %14, %6 : vector<8x128xf32>
    %16 = vector.broadcast %7 : vector<1x128xf32> to vector<8x128xf32>
    %17 = arith.mulf %16, %15 : vector<8x128xf32>
    %18 = arith.addf %6, %17 : vector<8x128xf32>
    %19 = vector.broadcast %8 : vector<1x128xf32> to vector<8x128xf32>
    %20 = arith.mulf %18, %19 : vector<8x128xf32>
    %21 = arith.mulf %20, %20 : vector<8x128xf32>
    %cst_12 = arith.constant dense<0.000000e+00> : vector<8xf32>
    %22 = vector.multi_reduction <add>, %21, %cst_12 [1] : vector<8x128xf32> to vector<8xf32>
    %23 = vector.shape_cast %22 : vector<8xf32> to vector<8x1xf32>
    %cst_13 = arith.constant 1.000000e-24 : f32
    %24 = vector.broadcast %cst_13 : f32 to vector<8x1xf32>
    %25 = arith.maximumf %23, %24 : vector<8x1xf32>
    %26 = math.rsqrt %25 : vector<8x1xf32>
    %cst_14 = arith.constant 1.000000e+00 : f32
    %27 = vector.broadcast %cst_14 : f32 to vector<8x1xf32>
    %28 = arith.subf %26, %27 : vector<8x1xf32>
    %29 = vector.broadcast %8 : vector<1x128xf32> to vector<8x128xf32>
    %30 = vector.broadcast %28 : vector<8x1xf32> to vector<8x128xf32>
    %31 = arith.mulf %29, %30 : vector<8x128xf32>
    %cst_15 = arith.constant 1.000000e+00 : f32
    %32 = vector.broadcast %cst_15 : f32 to vector<8x128xf32>
    %33 = arith.addf %32, %31 : vector<8x128xf32>
    %34 = arith.mulf %18, %33 : vector<8x128xf32>
    %c0_16 = arith.constant 0 : index
    %c0_17 = arith.constant 0 : index
    %35 = vector.load %arg6[%c0_16, %c0_17] : memref<8x128xf32, #tpu.memory_space<vmem>>, vector<8x128xf32>
    tpu.vector_store %arg6[%c0_16, %c0_17], %34 {strides = array<i32>} : memref<8x128xf32, #tpu.memory_space<vmem>>, vector<8x128xf32>,
    return
  }
  func.func @transform_0(%arg0: i32) -> (i32, i32) {
    %c0_i32 = arith.constant 0 : i32
    %c0_i32_0 = arith.constant 0 : i32
    return %arg0, %c0_i32 : i32, i32
  }
  func.func @transform_1(%arg0: i32) -> (i32, i32) {
    %c0_i32 = arith.constant 0 : i32
    %c0_i32_0 = arith.constant 0 : i32
    %c0_i32_1 = arith.constant 0 : i32
    return %c0_i32, %c0_i32_0 : i32, i32
  }
  func.func @transform_2(%arg0: i32) -> (i32, i32) {
    %c0_i32 = arith.constant 0 : i32
    %c0_i32_0 = arith.constant 0 : i32
    %c0_i32_1 = arith.constant 0 : i32
    return %c0_i32, %c0_i32_0 : i32, i32
  }
  func.func @transform_3(%arg0: i32) -> (i32, i32) {
    %c0_i32 = arith.constant 0 : i32
    %c0_i32_0 = arith.constant 0 : i32
    %c0_i32_1 = arith.constant 0 : i32
    return %c0_i32, %c0_i32_0 : i32, i32
  }
  func.func @transform_4(%arg0: i32) -> (i32, i32) {
    %c0_i32 = arith.constant 0 : i32
    %c0_i32_0 = arith.constant 0 : i32
    %c0_i32_1 = arith.constant 0 : i32
    return %c0_i32, %c0_i32_0 : i32, i32
  }
  func.func @transform_5(%arg0: i32) -> (i32, i32) {
    %c0_i32 = arith.constant 0 : i32
    %c0_i32_0 = arith.constant 0 : i32
    return %arg0, %c0_i32 : i32, i32
  }
}

</mosaic_0001>

<bundles_post_ra>
// kernel: tpu_custom_call.1
= control target key start
LH: loop header
LB: loop body
LE: loop exit
PB: predicated region body
PF: predicated region fallthrough
CT: control target
= control target key end

     0   :  { %10 = vsyncpa [#allocation3], 0  ;;  %s296_s0 = inlined_call_operand.hbm [shape: f32[8,32], index: 0, kind: input, shape index: {}]   ;;  %s297_s1 = inlined_call_operand.hbm [shape: bf16[32,128], index: 1, kind: input, shape index: {}]   ;;  %s298_s2 = inlined_call_operand.vmem [shape: f32[1,128], index: 2, kind: input, shape index: {}]   ;;  %s299_s3 = inlined_call_operand.vmem [shape: f32[1,128], index: 3, kind: input, shape index: {}]   ;;  %s300_s4 = inlined_call_operand.vmem [shape: f32[1,128], index: 4, kind: input, shape index: {}]   ;;  %s301_s5 = inlined_call_operand.hbm [shape: f32[8,128], index: 5, kind: output, shape index: {}]  }
   0x1   :  { %11 = vsyncpa [#allocation6], 0 }
   0x2   :  { %12 = vsyncpa [#allocation4], 0  ;;  %s18_s20 = sshll.u32 %s296_s0, 4  ;;  %s243_s21 = smov [#allocation2]   ;;  %s19_s20 = int_to_ptr.hbm [resolvable:$true] %s18_s20 }
   0x3   :  { %s20_s22 = sshll.u32 %s243_s21, 4  ;;  %s28_s25 = sshll.u32 %s297_s1, 4  ;;  %s21_s22 = int_to_ptr.vmem [resolvable:$true] %s20_s22  ;;  %s29_s25 = int_to_ptr.hbm [resolvable:$true] %s28_s25 }
   0x4   :  { %23 = dma.hbm_to_vmem [thread:$0]  %s19_s20, 128, %s21_s22, [#allocation3]  }
   0x5   :  { %s244_s26 = smov [#allocation5]   ;;  %s245_s28 = smov 64  }
   0x6   :  { %s30_s27 = sshll.u32 %s244_s26, 4  ;;  %s246_s29 = smov 4   ;;  %s31_s27 = int_to_ptr.vmem [resolvable:$true] %s30_s27 }
   0x7   :  { %36 = dma.hbm_to_vmem [thread:$0]  %s29_s25, 256, %s31_s27, [#allocation6], %s245_s28, %s245_s28, %s246_s29  }
   0x8   :  { %237 = dma.done.wait [#allocation3], 128  }
   0x9   :  { %238 = vsyncadd [#allocation3], 4294967168 }
   0xa   :  { %239 = dma.done.wait [#allocation6], 256  }
   0xb   :  { %240 = vsyncadd [#allocation6], 4294967040  ;;  %v154_v0 = vld [vmem:[#allocation5 + $0x8] sm:$0xff]  ;;  %v153_v1 = vld [vmem:[#allocation5] sm:$0xff]  ;;  %vm74_vm0 = vcmask 261120   ;;  %s132_s10 = sshll.u32 %s301_s5, 4  ;;  %s133_s10 = int_to_ptr.hbm [resolvable:$true] %s132_s10 }
   0xc   :  { %84 = vmatpush.bf16.msra.mxu0 %v154_v0  ;;  %v52_v2 = vld [vmem:[#allocation2] sm:$0xff] }
   0xd   :  { %v53_v3 = vpack.c.bf16 %v52_v2, %v52_v2  ;;  %v160_v4 = vld [vmem:[%s298_s2] ss:$0 sm:$0xff]  ;;  %s247_s2 = smov [#allocation7]  }
   0xe   :  { %v161_v10 = vld [vmem:[%s299_s3] ss:$0 sm:$0xff]  ;;  %s130_s3 = sshll.u32 %s247_s2, 4  ;;  %s131_s3 = int_to_ptr.vmem [resolvable:$true] %s130_s3 }
   0xf   :  { %v162_v14 = vld [vmem:[%s300_s4] ss:$0 sm:$0xff] }
  0x10   :  { %85 = vmatpush.bf16.msra.mxu0 %v153_v1 }
  0x13   :  { %151 = vmatmul.msk.bf16.vlgmr.msra.gmra.mxu0 %vm74_vm0, %v53_v3 }
  0x90   :  { %v87_v5 = vpop.f32.mrf.mxu0 }
  0x91   :  { %v88_v6 = vadd.f32 %v160_v4, %v87_v5 }
  0x93   :  { %v93_v7 = vadd.f32 1.0, %v88_v6 }
  0x95   :  { %v94_v8 = vmax.f32 %v93_v7, 0.0 }
  0x97   :  { %v95_v9 = vadd.f32 1e-12, %v94_v8 }
  0x98   :  { %v89_v11 = vpop.f32.mrf.mxu0 }
  0x99   :  { %v96_v12 = vsub.f32 %v95_v9, %v88_v6 }
  0x9b   :  { %v100_v13 = vmul.f32 %v161_v10, %v96_v12 }
  0x9d   :  { %v101_v15 = vadd.f32 %v100_v13, %v88_v6 }
  0x9f   :  { %v105_v16 = vmul.f32 %v162_v14, %v101_v15 }
  0xa1   :  { %v106_v17 = vmul.f32 %v105_v16, %v105_v16 }
  0xa3   :  { %107 = vadd.xlane.f32.xlu0 %v106_v17 }
 0x116   :  { %v108_v18 = vpop.xlane.xlu0 %107 }
 0x117   :  { %v109_v19 = vmax.f32 %v108_v18, 1e-24 }
 0x119   :  { %163 = vrsqrt.f32 %v109_v19  ;;  %vm116_vm2 = vweird.f32 %v109_v19 }
 0x11f   :  { %v164_v20 = vpop.eup %163 }
 0x120   :  { %v111_v21 = vmul.f32 %v164_v20, %v109_v19  ;;  %vm117_vm1 = vweird.f32 %v164_v20 }
 0x121   :  { %vm118_vm3 = vmor %vm116_vm2, %vm117_vm1 }
 0x122   :  { %v112_v22 = vmul.f32 %v164_v20, %v111_v21 }
 0x124   :  { %v113_v23 = vmul.f32 0.5, %v112_v22 }
 0x126   :  { %v114_v24 = vsub.f32 1.5, %v113_v23 }
 0x128   :  { %v115_v25 = vmul.f32 %v164_v20, %v114_v24 }
 0x12a   :  { %v119_v26 = vsel %vm118_vm3, %v164_v20, %v115_v25 }
 0x12b   :  { %v152_v27 = vadd.f32 -1.0, %v119_v26 }
 0x12d   :  { %v121_v28 = vmul.f32 %v162_v14, %v152_v27 }
 0x12f   :  { %v122_v29 = vadd.f32 1.0, %v121_v28 }
 0x131   :  { %v123_v30 = vmul.f32 %v122_v29, %v101_v15 }
 0x133   :  { %124 = vst [vmem:[#allocation7] sm:$0xff] %v123_v30 }
 0x134   :  { %135 = dma.vmem_to_hbm [thread:$0]  %s131_s3, 128, %s133_s10, [#allocation4]  }
 0x135   :  { %241 = dma.done.wait [#allocation4], 128  }
 0x136   :  { %242 = vsyncadd [#allocation4], 4294967168 }
 0x137   :  { %140 = vsyncpa [#allocation3], 1 }
 0x138   :  { %141 = vsyncpa [#allocation6], 1 }
 0x139   :  { %142 = vsyncpa [#allocation4], 1 }

</bundles_post_ra>
